<compile_context>
chip_gen: v6e
topology: v6e:2x2x1
jax: 0.10.0
libtpu: 0.0.40
codegen_flags: <defaults>
</compile_context>

<pallas_src>
import functools
import math

import jax
import jax.numpy as jnp
from jax.experimental import pallas as pl
from jax.experimental.pallas import tpu as pltpu

_MiB = 1024 * 1024


def _round_up(a, b):
    return (a + b - 1) // b * b


def _pick_ti(i_pad, ti_req):
    """Largest multiple of 128 that divides i_pad and is <= ti_req (i_pad % 128 == 0)."""
    ti_req = max(128, min(ti_req, i_pad))
    for d in range(ti_req - ti_req % 128, 127, -128):
        if i_pad % d == 0:
            return d
    return 128


def _tpu_vmem_capacity_bytes():
    try:
        cap = getattr(pltpu.get_tpu_info(), "vmem_capacity_bytes", None)
        if cap:
            return int(cap)
    except Exception:
        pass
    return 64 * _MiB  # conservative (v7x-sized) fallback


def _working_set_bytes(tm, ti, H, cb, wb, ob):
    # Double-buffered x / out / streamed-weight tiles + f32 accumulator scratch.
    return (2 * tm * H * cb            # x tile
            + 2 * tm * H * ob          # out tile
            + 2 * H * (2 * ti) * wb    # fused [gate|up] weight tile
            + 2 * ti * H * wb          # down weight tile
            + tm * H * 4)              # f32 accumulator


def _ffn_kernel(x_ref, wgu_ref, wd_ref, o_ref, acc_ref, *, ti, approx_silu):
    # x_ref : (tm, H)   wgu_ref : (H, 2*ti)   wd_ref : (ti, H)
    # o_ref : (tm, H)   acc_ref : (tm, H) f32 scratch (accumulates over the I axis)
    k = pl.program_id(1)

    @pl.when(k == 0)
    def _init():
        acc_ref[...] = jnp.zeros_like(acc_ref)

    # Fused gate+up projection: a single MXU pass over the shared, resident x tile
    # (f32 accumulation via preferred_element_type).
    gu = jnp.dot(x_ref[...], wgu_ref[...], preferred_element_type=jnp.float32)
    g = gu[:, :ti]          # static, lane-aligned slices (ti is a multiple of 128)
    u = gu[:, ti:]

    # SiLU in f32. exp issues on the EUP; reciprocal also goes to the EUP on the
    # approx (production / bf16) path, keeping the VALU slots free.
    s = pl.reciprocal(1.0 + jnp.exp(-g), approx=approx_silu)
    b = (g * s * u).astype(wd_ref.dtype)

    # Streamed down projection, accumulated over the I tiles.
    acc_ref[...] += jnp.dot(b, wd_ref[...], preferred_element_type=jnp.float32)

    @pl.when(k == pl.num_programs(1) - 1)
    def _finalize():
        # Single cast+store pass (matters on v5e's single vst slot).
        # TODO(synk): dropout(p=0.0) is identity; non-zero dropout would need pltpu.prng_* masking.
        o_ref[...] = acc_ref[...].astype(o_ref.dtype)


def feed_forward(x, w_gate, w_up, w_down, *, tm=None, ti=None,
                 vmem_limit_bytes=None, approx_silu=None, single_buffer_io=False):
    """x: (M, H) tokens; w_gate/w_up: (H, I); w_down: (I, H). Returns (M, H).

    In production use bf16 weights: matmuls then run bf16 on the MXU with f32
    accumulation (an f32 second operand forces multi-pass MXU mode on v5e).
    """
    M, H = x.shape
    I = w_gate.shape[1]

    w_dtype = w_gate.dtype
    out_dtype = x.dtype
    if approx_silu is None:
        # Exact sigmoid for f32 (tight-tolerance tests); approx EUP path for bf16/fp8 prod.
        approx_silu = (jnp.dtype(w_dtype) != jnp.dtype(jnp.float32))

    # ---- per-generation tile defaults & VMEM targets -------------------------------
    # Arithmetic intensity ≈ tm flops per streamed weight byte; roofline knees are
    # ~650 (v6e), ~310 (v7x), ~240 (v5e) flops/byte for bf16 weights.
    vmem_cap = _tpu_vmem_capacity_bytes()
    if vmem_cap >= 96 * _MiB:          # v5e / v6e (128 MiB physical VMEM)
        tm_def, ti_def, vmem_target = 768, 512, 100 * _MiB
    else:                              # v7x (64 MiB physical VMEM per TensorCore)
        tm_def, ti_def, vmem_target = 512, 256, 56 * _MiB
    if tm is None:
        tm = tm_def
    if ti is None:
        ti = ti_def

    # ---- token tile: 8-sublane aligned, clamped to the problem ----
    tm = max(8, _round_up(min(tm, _round_up(M, 8)), 8))

    # ---- intermediate dim: pad to a 128 multiple (zero-padded gate/up columns give
    # silu(0)*u == 0 and the padded down-proj rows are zero, so the result is exact),
    # then pick the largest 128-aligned divisor <= requested ti so weights stream ----
    I_pad = _round_up(I, 128)
    if I_pad != I:
        w_gate = jnp.pad(w_gate, ((0, 0), (0, I_pad - I)))
        w_up = jnp.pad(w_up, ((0, 0), (0, I_pad - I)))
        w_down = jnp.pad(w_down, ((0, I_pad - I), (0, 0)))
    ti = _pick_ti(I_pad, ti)

    # ---- shrink tiles until the working set fits the generation's VMEM budget ----
    cb = jnp.dtype(w_dtype).itemsize   # x is cast to the weight dtype below
    wb = jnp.dtype(w_dtype).itemsize
    ob = jnp.dtype(out_dtype).itemsize
    budget = int(0.9 * vmem_target)    # leave headroom for compiler-internal scratch
    while _working_set_bytes(tm, ti, H, cb, wb, ob) > budget:
        if ti > 128:
            ti = _pick_ti(I_pad, ti // 2)
        elif tm > 128:
            tm = max(128, _round_up(tm // 2, 8))
        else:
            break

    Mp = _round_up(M, tm)
    if Mp != M:
        x = jnp.pad(x, ((0, Mp - M), (0, 0)))

    # Cast tokens to the weight dtype ONCE here (not per-k inside the kernel).
    x = x.astype(w_dtype)

    # Fuse gate & up weights tile-interleaved: block k of the fused array holds
    # [gate tile k | up tile k], so one BlockSpec / one MXU pass covers both.
    # TODO(synk): hoist this fuse (and the I padding) to weight-prep time in production
    # so it is not re-done per forward call.
    n_i = I_pad // ti
    wgu = jnp.concatenate(
        [w_gate.reshape(H, n_i, ti), w_up.reshape(H, n_i, ti)], axis=2
    ).reshape(H, 2 * I_pad)

    grid = (Mp // tm, I_pad // ti)
    # Megacore note: the token axis is "parallel" (sharded across v7x's 2 TCs); both TCs
    # re-stream the same weight tiles, so tm must clear the per-TC roofline knee.
    # TODO(synk): for tiny-M decode shapes, split the I axis across cores with a
    # partial-sum combine instead of splitting tokens.

    if vmem_limit_bytes is None:
        ws = _working_set_bytes(tm, ti, H, cb, wb, ob)
        vmem_limit_bytes = int(min(vmem_target, max(32 * _MiB, int(1.5 * ws))))

    # Real HBM traffic: all three weight matrices are re-streamed once per token tile.
    n_tok_tiles = Mp // tm
    cost = pl.CostEstimate(
        flops=6 * Mp * H * I_pad,                       # gate + up + down matmuls
        transcendentals=Mp * I_pad,                     # exp in SiLU
        bytes_accessed=n_tok_tiles * 3 * H * I_pad * wb + Mp * H * (cb + ob),
    )

    # x/out block indices are constant along k (revisited, no re-DMA); optionally
    # single-buffer them to reclaim ~2*tm*H bytes of VMEM on v7x (off by default).
    if single_buffer_io:
        x_spec = pl.BlockSpec((tm, H), lambda i, k: (i, 0), pipeline_mode=pl.Buffered(1))
        o_spec = pl.BlockSpec((tm, H), lambda i, k: (i, 0), pipeline_mode=pl.Buffered(1))
    else:
        x_spec = pl.BlockSpec((tm, H), lambda i, k: (i, 0))
        o_spec = pl.BlockSpec((tm, H), lambda i, k: (i, 0))

    kernel = functools.partial(_ffn_kernel, ti=ti, approx_silu=bool(approx_silu))

    out = pl.pallas_call(
        kernel,
        out_shape=jax.ShapeDtypeStruct((Mp, H), out_dtype),
        grid_spec=pltpu.PrefetchScalarGridSpec(
            num_scalar_prefetch=0,
            grid=grid,
            in_specs=[
                x_spec,                                           # x tile (revisited along k)
                pl.BlockSpec((H, 2 * ti), lambda i, k: (0, k)),   # fused [gate|up] weight tile
                pl.BlockSpec((ti, H), lambda i, k: (k, 0)),       # down weight tile
            ],
            out_specs=o_spec,
            scratch_shapes=[pltpu.VMEM((tm, H), jnp.float32)],
        ),
        compiler_params=pltpu.CompilerParams(
            dimension_semantics=("parallel", "arbitrary"),
            vmem_limit_bytes=int(vmem_limit_bytes),
        ),
        cost_estimate=cost,
    )(x, wgu, w_down)

    return out[:M] if Mp != M else out


def reference_ffn(x, w_gate, w_up, w_down):
    g = x @ w_gate
    y = g * jax.nn.sigmoid(g)     # SiLU
    a = x @ w_up
    return (y * a) @ w_down


if __name__ == "__main__":
    # Small shapes consistent with the module:
    #   hidden_dim = 32  ->  intermediate_size = 64 * ceil((32*8/3)/64) = 128
    batch, seq, hidden = 2, 8, 32
    intermediate = 64 * ((int(hidden * 8 / 3) + 64 - 1) // 64)   # = 128

    key = jax.random.PRNGKey(0)
    kx, kg, ku, kd = jax.random.split(key, 4)

    x = jax.random.normal(kx, (batch, seq, hidden), dtype=jnp.float32)

    # Deterministic parameter init (nn.Linear default-ish scale); stored as (in, out)
    # so the kernel computes x @ W (equivalent to PyTorch's x @ weight.T).
    lim_g = 1.0 / math.sqrt(hidden)
    lim_d = 1.0 / math.sqrt(intermediate)
    w_gate = jax.random.uniform(kg, (hidden, intermediate), jnp.float32, -lim_g, lim_g)
    w_up   = jax.random.uniform(ku, (hidden, intermediate), jnp.float32, -lim_g, lim_g)
    w_down = jax.random.uniform(kd, (intermediate, hidden), jnp.float32, -lim_d, lim_d)

    # Flatten (B, S, H) -> (B*S, H) tokens for the kernel, reshape back after.
    x2d = x.reshape(batch * seq, hidden)
    out2d = feed_forward(x2d, w_gate, w_up, w_down)
    out = out2d.reshape(batch, seq, hidden)
    jax.block_until_ready(out)

    # Correctness check against the pure-JAX reference. f32 weights -> exact-sigmoid
    # kernel path -> tight tolerance; bf16 production weights (approx_silu=True) would
    # need a dtype-aware, looser tolerance.
    ref = reference_ffn(x2d, w_gate, w_up, w_down).reshape(batch, seq, hidden)
    assert jnp.allclose(out, ref, atol=1e-5, rtol=1e-5), "mismatch vs reference"

    print("KERNEL_OK")
</pallas_src>

<mosaic_0001>
module attributes {stable_mosaic.version = 11 : i64} {
  func.func @_ffn_kernel(%arg0: i32, %arg1: i32, %arg2: memref<16x32xf32, #tpu.memory_space<vmem>>, %arg3: memref<32x256xf32, #tpu.memory_space<vmem>>, %arg4: memref<128x32xf32, #tpu.memory_space<vmem>>, %arg5: memref<16x32xf32, #tpu.memory_space<vmem>>, %arg6: memref<16x32xf32, #tpu.memory_space<vmem>>) attributes {dimension_semantics = [#tpu.dimension_semantics<parallel>, #tpu.dimension_semantics<arbitrary>], iteration_bounds = array<i64: 1, 1>, scalar_prefetch = 0 : i64, scratch_operands = 1 : i64, tpu.core_type = #tpu.core_type<tc>, window_params = [{transform_indices = @transform_0, window_bounds = array<i64: 16, 32>}, {transform_indices = @transform_1, window_bounds = array<i64: 32, 256>}, {transform_indices = @transform_2, window_bounds = array<i64: 128, 32>}, {transform_indices = @transform_3, window_bounds = array<i64: 16, 32>}]} {
    %c0_i32 = arith.constant 0 : i32
    %0 = arith.cmpi eq, %arg1, %c0_i32 : i32
    %1 = arith.extui %0 : i1 to i32
    %c0_i32_0 = arith.constant 0 : i32
    %2 = arith.cmpi ne, %1, %c0_i32_0 : i32
    scf.if %2 {
      %cst_15 = arith.constant 0.000000e+00 : f32
      %24 = vector.broadcast %cst_15 : f32 to vector<16x32xf32>
      %c0_16 = arith.constant 0 : index
      %c0_17 = arith.constant 0 : index
      %25 = vector.load %arg6[%c0_16, %c0_17] : memref<16x32xf32, #tpu.memory_space<vmem>>, vector<16x32xf32>
      tpu.vector_store %arg6[%c0_16, %c0_17], %24 {strides = array<i32>} : memref<16x32xf32, #tpu.memory_space<vmem>>, vector<16x32xf32>,
    } else {
    }
    %c0 = arith.constant 0 : index
    %c0_1 = arith.constant 0 : index
    %3 = vector.load %arg2[%c0, %c0_1] : memref<16x32xf32, #tpu.memory_space<vmem>>, vector<16x32xf32>
    %c0_2 = arith.constant 0 : index
    %c0_3 = arith.constant 0 : index
    %4 = vector.load %arg3[%c0_2, %c0_3] : memref<32x256xf32, #tpu.memory_space<vmem>>, vector<32x256xf32>
    %cst = arith.constant dense<0.000000e+00> : vector<16x256xf32>
    %5 = tpu.matmul %3, %4, %cst {dimension_numbers = #tpu.dot_dimension_numbers<[1], [0], [0], [1], [0, 0, 1, 1], [], []>} : vector<16x32xf32>, vector<32x256xf32>, vector<16x256xf32> -> vector<16x256xf32>
    %6 = vector.extract_strided_slice %5 {offsets = [0, 0], sizes = [16, 128], strides = [1, 1]} : vector<16x256xf32> to vector<16x128xf32>
    %7 = vector.extract_strided_slice %5 {offsets = [0, 128], sizes = [16, 128], strides = [1, 1]} : vector<16x256xf32> to vector<16x128xf32>
    %cst_4 = arith.constant 0.000000e+00 : f32
    %8 = vector.broadcast %cst_4 : f32 to vector<16x128xf32>
    %9 = arith.subf %8, %6 : vector<16x128xf32>
    %10 = math.exp %9 : vector<16x128xf32>
    %cst_5 = arith.constant 1.000000e+00 : f32
    %11 = vector.broadcast %cst_5 : f32 to vector<16x128xf32>
    %12 = arith.addf %11, %10 : vector<16x128xf32>
    %13 = tpu.reciprocal %12 : vector<16x128xf32> -> vector<16x128xf32>
    %14 = arith.mulf %6, %13 : vector<16x128xf32>
    %15 = arith.mulf %14, %7 : vector<16x128xf32>
    %c0_6 = arith.constant 0 : index
    %c0_7 = arith.constant 0 : index
    %16 = vector.load %arg6[%c0_6, %c0_7] : memref<16x32xf32, #tpu.memory_space<vmem>>, vector<16x32xf32>
    %c0_8 = arith.constant 0 : index
    %c0_9 = arith.constant 0 : index
    %17 = vector.load %arg4[%c0_8, %c0_9] : memref<128x32xf32, #tpu.memory_space<vmem>>, vector<128x32xf32>
    %cst_10 = arith.constant dense<0.000000e+00> : vector<16x32xf32>
    %18 = tpu.matmul %15, %17, %cst_10 {dimension_numbers = #tpu.dot_dimension_numbers<[1], [0], [0], [1], [0, 0, 1, 1], [], []>} : vector<16x128xf32>, vector<128x32xf32>, vector<16x32xf32> -> vector<16x32xf32>
    %19 = arith.addf %16, %18 : vector<16x32xf32>
    %c0_11 = arith.constant 0 : index
    %c0_12 = arith.constant 0 : index
    %20 = vector.load %arg6[%c0_11, %c0_12] : memref<16x32xf32, #tpu.memory_space<vmem>>, vector<16x32xf32>
    tpu.vector_store %arg6[%c0_11, %c0_12], %19 {strides = array<i32>} : memref<16x32xf32, #tpu.memory_space<vmem>>, vector<16x32xf32>,
    %c0_i32_13 = arith.constant 0 : i32
    %21 = arith.cmpi eq, %arg1, %c0_i32_13 : i32
    %22 = arith.extui %21 : i1 to i32
    %c0_i32_14 = arith.constant 0 : i32
    %23 = arith.cmpi ne, %22, %c0_i32_14 : i32
    scf.if %23 {
      %c0_15 = arith.constant 0 : index
      %c0_16 = arith.constant 0 : index
      %24 = vector.load %arg6[%c0_15, %c0_16] : memref<16x32xf32, #tpu.memory_space<vmem>>, vector<16x32xf32>
      %c0_17 = arith.constant 0 : index
      %c0_18 = arith.constant 0 : index
      %25 = vector.load %arg5[%c0_17, %c0_18] : memref<16x32xf32, #tpu.memory_space<vmem>>, vector<16x32xf32>
      tpu.vector_store %arg5[%c0_17, %c0_18], %24 {strides = array<i32>} : memref<16x32xf32, #tpu.memory_space<vmem>>, vector<16x32xf32>,
    } else {
    }
    return
  }
  func.func @transform_0(%arg0: i32, %arg1: i32) -> (i32, i32) {
    %c0_i32 = arith.constant 0 : i32
    %c0_i32_0 = arith.constant 0 : i32
    return %arg0, %c0_i32 : i32, i32
  }
  func.func @transform_1(%arg0: i32, %arg1: i32) -> (i32, i32) {
    %c0_i32 = arith.constant 0 : i32
    %c0_i32_0 = arith.constant 0 : i32
    return %c0_i32, %arg1 : i32, i32
  }
  func.func @transform_2(%arg0: i32, %arg1: i32) -> (i32, i32) {
    %c0_i32 = arith.constant 0 : i32
    %c0_i32_0 = arith.constant 0 : i32
    return %arg1, %c0_i32 : i32, i32
  }
  func.func @transform_3(%arg0: i32, %arg1: i32) -> (i32, i32) {
    %c0_i32 = arith.constant 0 : i32
    %c0_i32_0 = arith.constant 0 : i32
    return %arg0, %c0_i32 : i32, i32
  }
}

</mosaic_0001>

<bundles_post_ra>
// kernel: tpu_custom_call.1
= control target key start
LH: loop header
LB: loop body
LE: loop exit
PB: predicated region body
PF: predicated region fallthrough
CT: control target
= control target key end

     0   :  { %vm19_vm0 = vcmask 261120   ;;  %v339_v4 = vmov 0.0   ;;  %s452_s0 = inlined_call_operand.vmem [shape: f32[16,32], index: 0, kind: input, shape index: {}]   ;;  %s453_s1 = inlined_call_operand.vmem [shape: f32[32,256], index: 1, kind: input, shape index: {}]   ;;  %s454_s2 = inlined_call_operand.vmem [shape: f32[128,32], index: 2, kind: input, shape index: {}]   ;;  %s455_s3 = inlined_call_operand.hbm [shape: f32[16,32], index: 3, kind: output, shape index: {}]  }
   0x1   :  { %v31_v0 = vld [vmem:[%s453_s1 + $0x38] sm:$0xff]  ;;  %v30_v1 = vld [vmem:[%s453_s1 + $0x30] sm:$0xff]  ;;  %v29_v2 = vld [vmem:[%s453_s1 + $0x28] sm:$0xff]  ;;  %20 = vst.msk [vmem:[#allocation2] sm:$0xff] %vm19_vm0, %v339_v4  ;;  %103 = vmatprep.mubr.f32.mxu0 %v339_v4 }
   0x2   :  { %63 = vmatprep.subr.mxu0 %v31_v0  ;;  %v28_v3 = vld [vmem:[%s453_s1 + $0x20] sm:$0xff]  ;;  %21 = vst.msk [vmem:[#allocation2 + $0x8] sm:$0xff] %vm19_vm0, %v339_v4  ;;  %v27_v5 = vld [vmem:[%s453_s1 + $0x18] sm:$0xff]  ;;  %v26_v6 = vld [vmem:[%s453_s1 + $0x10] sm:$0xff] }
   0x3   :  { %64 = vmatpush1.msra.mxu0 %v30_v1 }
   0x4   :  { %65 = vmatprep.subr.mxu0 %v29_v2 }
   0x5   :  { %8 = vsyncpa [#allocation4], 0  ;;  %66 = vmatpush1.msra.mxu0 %v28_v3  ;;  %v25_v7 = vld [vmem:[%s453_s1 + $0x8] sm:$0xff]  ;;  %v24_v8 = vld [vmem:[%s453_s1] sm:$0xff] }
   0x6   :  { %67 = vmatprep.subr.mxu0 %v27_v5  ;;  %v22_v9 = vld [vmem:[%s452_s0] sm:$0xff]  ;;  %v23_v10 = vld [vmem:[%s452_s0 + $0x8] sm:$0xff]  ;;  %v147_v11 = vld [vmem:[%s454_s2 + $0x78] sm:$0xff] }
   0x7   :  { %68 = vmatpush1.msra.mxu0 %v26_v6  ;;  %270 = vmatprep.subr.mxu1 %v147_v11  ;;  %v146_v12 = vld [vmem:[%s454_s2 + $0x70] sm:$0xff]  ;;  %v145_v13 = vld [vmem:[%s454_s2 + $0x68] sm:$0xff]  ;;  %v144_v14 = vld [vmem:[%s454_s2 + $0x60] sm:$0xff] }
   0x8   :  { %69 = vmatprep.subr.mxu0 %v25_v7  ;;  %271 = vmatpush3.msra.mxu1 %v147_v11  ;;  %v143_v15 = vld [vmem:[%s454_s2 + $0x58] sm:$0xff]  ;;  %v142_v16 = vld [vmem:[%s454_s2 + $0x50] sm:$0xff]  ;;  %v141_v17 = vld [vmem:[%s454_s2 + $0x48] sm:$0xff] }
   0x9   :  { %70 = vmatpush1.msra.mxu0 %v24_v8  ;;  %272 = vmatprep.subr.mxu1 %v146_v12  ;;  %v140_v18 = vld [vmem:[%s454_s2 + $0x40] sm:$0xff]  ;;  %v139_v19 = vld [vmem:[%s454_s2 + $0x38] sm:$0xff]  ;;  %v138_v20 = vld [vmem:[%s454_s2 + $0x30] sm:$0xff] }
   0xa   :  { %250 = vmatmul.mubr.msk.f32.vlgmr.msra.gmra.mxu0 %vm19_vm0, %v22_v9  ;;  %273 = vmatpush3.msra.mxu1 %v146_v12  ;;  %v137_v21 = vld [vmem:[%s454_s2 + $0x28] sm:$0xff]  ;;  %v136_v22 = vld [vmem:[%s454_s2 + $0x20] sm:$0xff]  ;;  %v135_v23 = vld [vmem:[%s454_s2 + $0x18] sm:$0xff] }
   0xb   :  { %109 = vmatprep.mubr.f32.mxu0 %v339_v4  ;;  %274 = vmatprep.subr.mxu1 %v145_v13  ;;  %v134_v24 = vld [vmem:[%s454_s2 + $0x10] sm:$0xff]  ;;  %v133_v25 = vld [vmem:[%s454_s2 + $0x8] sm:$0xff]  ;;  %v132_v26 = vld [vmem:[%s454_s2] sm:$0xff]  ;;  %s340_s2 = smov [#allocation3]  }
   0xc   :  { %275 = vmatpush3.msra.mxu1 %v145_v13  ;;  %v131_v45 = vld [vmem:[#allocation2 + $0x8] sm:$0xff]  ;;  %v130_v47 = vld [vmem:[#allocation2] sm:$0xff]  ;;  %s239_s7 = sshll.u32 %s340_s2, 4  ;;  %s240_s7 = int_to_ptr.vmem [resolvable:$true] %s239_s7 }
   0xd   :  { %276 = vmatprep.subr.mxu1 %v144_v14  ;;  %s317_s8 = scalar_lea.vmem %s240_s7, 256  ;;  %p322_p1 = scmp.lt.s32.totalorder %s240_s7, %s240_s7 }
   0xe   :  { %251 = vmatmul.mubr.msk.f32.gmra.mxu0 %vm19_vm0, %v23_v10  ;;  %277 = vmatpush3.msra.mxu1 %v144_v14  ;;  %p318_p0 = scmp.ne.s32.totalorder %s240_s7, %s317_s8  ;;  %p323_p2 = scmp.lt.s32.totalorder %s317_s8, %s317_s8 }
   0xf   :  { %278 = vmatprep.subr.mxu1 %v143_v15 }
  0x10   :  { %279 = vmatpush3.msra.mxu1 %v143_v15  ;;  %p324_p3 = por %p323_p2, %p322_p1 }
  0x11   :  { %280 = vmatprep.subr.mxu1 %v142_v16 }
  0x12   :  { %281 = vmatpush3.msra.mxu1 %v142_v16  ;;  %p325_p4 = pnand %p324_p3, %p318_p0 }
  0x13   :  { %282 = vmatprep.subr.mxu1 %v141_v17 }
  0x14   :  { %283 = vmatpush3.msra.mxu1 %v141_v17 }
  0x15   :  { %284 = vmatprep.subr.mxu1 %v140_v18 }
  0x16   :  { %285 = vmatpush3.msra.mxu1 %v140_v18 }
  0x17   :  { %286 = vmatprep.subr.mxu1 %v139_v19 }
  0x18   :  { %287 = vmatpush3.msra.mxu1 %v139_v19 }
  0x19   :  { %288 = vmatprep.subr.mxu1 %v138_v20 }
  0x1a   :  { %289 = vmatpush3.msra.mxu1 %v138_v20 }
  0x1b   :  { %290 = vmatprep.subr.mxu1 %v137_v21 }
  0x1c   :  { %291 = vmatpush3.msra.mxu1 %v137_v21 }
  0x1d   :  { %292 = vmatprep.subr.mxu1 %v136_v22 }
  0x1e   :  { %293 = vmatpush3.msra.mxu1 %v136_v22 }
  0x1f   :  { %294 = vmatprep.subr.mxu1 %v135_v23 }
  0x20   :  { %295 = vmatpush3.msra.mxu1 %v135_v23 }
  0x21   :  { %296 = vmatprep.subr.mxu1 %v134_v24 }
  0x22   :  { %297 = vmatpush3.msra.mxu1 %v134_v24 }
  0x23   :  { %298 = vmatprep.subr.mxu1 %v133_v25 }
  0x24   :  { %299 = vmatpush3.msra.mxu1 %v133_v25 }
  0x25   :  { %300 = vmatprep.subr.mxu1 %v132_v26 }
  0x26   :  { %301 = vmatpush3.msra.mxu1 %v132_v26 }
  0xca   :  { %v105_v27 = vpop.f32.mrf.mxu0 }
  0xcb   :  { %v116_v28 = vsub.f32 0.0, %v105_v27 }
  0xcc   :  { %v107_v29 = vpop.f32.mrf.mxu0 }
  0xcd   :  { %v118_v30 = vmul.f32 1.442695, %v116_v28 }
  0xce   :  { %v111_v31 = vpop.f32.mrf.mxu0 }
  0xcf   :  { %309 = vpow2.f32 %v118_v30  ;;  %v117_v32 = vsub.f32 0.0, %v111_v31 }
  0xd0   :  { %v113_v43 = vpop.f32.mrf.mxu0 }
  0xd1   :  { %v120_v33 = vmul.f32 1.442695, %v117_v32 }
  0xd3   :  { %311 = vpow2.f32 %v120_v33 }
  0xdc   :  { %v310_v34 = vpop.eup %309 }
  0xdd   :  { %v122_v35 = vadd.f32 1.0, %v310_v34 }
  0xdf   :  { %313 = vrcp.f32 %v122_v35 }
  0xe0   :  { %v312_v36 = vpop.eup %311 }
  0xe1   :  { %v123_v37 = vadd.f32 1.0, %v312_v36 }
  0xe3   :  { %315 = vrcp.f32 %v123_v37 }
  0xec   :  { %v314_v38 = vpop.eup %313 }
  0xed   :  { %v126_v39 = vmul.f32 %v314_v38, %v105_v27 }
  0xef   :  { %v128_v40 = vmul.f32 %v126_v39, %v107_v29 }
  0xf0   :  { %v316_v41 = vpop.eup %315 }
  0xf1   :  { %v127_v42 = vmul.f32 %v316_v41, %v111_v31  ;;  %302 = vmatprep.mubr.f32.mxu1 %v128_v40 }
  0xf3   :  { %v129_v44 = vmul.f32 %v127_v42, %v113_v43 }
  0xf5   :  { %303 = vmatmul.mubr.f32.vlgmr.msra.gmra.mxu1 %v129_v44 }
 0x1b5   :  { %v304_v46 = vpop.f32.mrf.mxu1 }
 0x1b6   :  { %v224_v48 = vadd.f32 %v304_v46, %v131_v45 }
 0x1b7   :  { %v214_v49 = vpop.f32.mrf.mxu1 }
 0x1b8   :  { %226 = vst.msk [vmem:[#allocation2 + $0x8] sm:$0xff] %vm19_vm0, %v224_v48  ;;  %v223_v50 = vadd.f32 %v214_v49, %v130_v47 }
 0x1ba   :  { %225 = vst.msk [vmem:[#allocation2] sm:$0xff] %vm19_vm0, %v223_v50 }
 0x1bf   :  { %v231_v51 = vld [vmem:[#allocation2 + $0x8] sm:$0xff] }
 0x1c0   :  { %233 = vst.msk [vmem:[#allocation3 + $0x8] sm:$0xff] %vm19_vm0, %v231_v51 }
 0x1c1   :  { %v230_v52 = vld [vmem:[#allocation2] sm:$0xff] }
 0x1c2   :  { %232 = vst.msk [vmem:[#allocation3] sm:$0xff] %vm19_vm0, %v230_v52 }
 0x1c3   :  { %328 = shalt.err (!%p325_p4)
}
 0x1c4   :  { %s341_s9 = smov 128   ;;  %s342_s0 = smov 8  }
 0x1c5   :  { %245 = dma.vmem_to_hbm [thread:$0]  %s240_s7, 256, %s455_s3, [#allocation4], %s341_s9, %s341_s9, %s342_s0  }
 0x1c6   :  { %337 = dma.done.wait [#allocation4], 256  }
 0x1c7   :  { %338 = vsyncadd [#allocation4], 4294967040 }
 0x1c8   :  { %249 = vsyncpa [#allocation4], 1 }

</bundles_post_ra>
